<compile_context>
chip_gen: v7x
topology: tpu7x:2x2x1
jax: 0.10.0
libtpu: 0.0.40
codegen_flags: <defaults>
</compile_context>

<pallas_src>
import functools

import jax
import jax.numpy as jnp
import numpy as np
from jax import lax
from jax.experimental import pallas as pl
from jax.experimental.pallas import tpu as pltpu

KW = 64                      # conv kernel width == stride width
BN_EPS = 1e-5                # PyTorch BatchNorm2d default eps
LANES = 128                  # TPU lane width
SUBLANES = 8                 # f32 sublane count
TM_MAX = 512                 # M-tile rows (could go 1024 on v5e/v6e; keep for v7x)
VMEM_LIMIT = 32 * 1024 * 1024


def _round_up(x, m):
    return (x + m - 1) // m * m


# ---------------------------------------------------------------------------
# Pass 1: y = X @ W (MXU), cache bf16 y tile, accumulate per-channel partial
# sum / sum-of-squares into this split's resident (8, Cpad) block.
# ---------------------------------------------------------------------------
def _matmul_stats_kernel(x_ref, w_ref, y_ref, sum_ref, sumsq_ref):
    @pl.when(pl.program_id(1) == 0)
    def _():
        sum_ref[...] = jnp.zeros_like(sum_ref)
        sumsq_ref[...] = jnp.zeros_like(sumsq_ref)

    y32 = jnp.dot(x_ref[...], w_ref[...], preferred_element_type=jnp.float32)
    y16 = y32.astype(jnp.bfloat16)
    y_ref[...] = y16                              # cache for pass 2 (no recompute)

    # Stats are taken from the bf16-cached values so pass 2 normalizes exactly
    # the data these statistics describe.  Partial sums keep the sublane axis
    # (8, Cpad): pure VPU adds, no cross-sublane reduction in the hot loop.
    yf = y16.astype(jnp.float32)
    tm, cp = yf.shape
    ps = yf.reshape(tm // SUBLANES, SUBLANES, cp)
    sum_ref[...] += jnp.sum(ps, axis=0)
    sumsq_ref[...] += jnp.sum(ps * ps, axis=0)


# ---------------------------------------------------------------------------
# Pass 2: pure-VPU epilogue on the cached y tile — reduce partial stats to the
# global mean/var, fused BN affine + ReLU.  Conv bias absorbed by mean subtract.
# ---------------------------------------------------------------------------
def _epilogue_kernel(y_ref, sum_ref, sumsq_ref, g_ref, b_ref, o_ref, *, inv_m):
    mean = jnp.sum(sum_ref[...], axis=0, keepdims=True) * inv_m      # (1, Cpad)
    ex2 = jnp.sum(sumsq_ref[...], axis=0, keepdims=True) * inv_m
    var = jnp.maximum(ex2 - mean * mean, 0.0)      # guard catastrophic cancellation
    scale = g_ref[...] * lax.rsqrt(var + BN_EPS)
    shift = b_ref[...] - mean * scale
    y = y_ref[...].astype(jnp.float32)
    o_ref[...] = jnp.maximum(y * scale + shift, 0.0).astype(o_ref.dtype)


def conv_bn_relu(x2d, w2d, gamma, beta, *, out_dtype=jnp.float32):
    """x2d: (M, K) patches, w2d: (K, C).  Returns padded (M_pad, Cpad) array;
    caller slices [:M, :C]."""
    M, K = x2d.shape
    C = w2d.shape[1]
    Cpad = _round_up(C, LANES)            # lane-dense stores + full-width MXU

    # bf16 operands for the MXU; padded channels are zero (gamma=0 -> output 0).
    x_bf = x2d.astype(jnp.bfloat16)
    w_bf = jnp.zeros((K, Cpad), jnp.bfloat16).at[:, :C].set(w2d.astype(jnp.bfloat16))
    g = jnp.zeros((1, Cpad), jnp.float32).at[0, :C].set(gamma.astype(jnp.float32))
    b = jnp.zeros((1, Cpad), jnp.float32).at[0, :C].set(beta.astype(jnp.float32))

    # M tiling: 512-row tiles when big enough, else one full (8-aligned) block.
    TM = TM_MAX if M >= TM_MAX else _round_up(M, SUBLANES)
    # v7x megacore: split the stats/matmul pass across the two TensorCores when
    # there is more than one M tile; each split owns an (8, Cpad) stats block.
    nsplit = 2 if (M + TM - 1) // TM >= 2 else 1
    M_pad = _round_up(M, TM * nsplit)
    if M_pad != M:
        # zero rows: contribute nothing to sum/sumsq; divisor below is the real M
        x_bf = jnp.pad(x_bf, ((0, M_pad - M), (0, 0)))
    n_tiles = M_pad // TM
    tiles_per_split = n_tiles // nsplit

    # ---- pass 1: matmul + cached y + per-split partial statistics ----------
    x_spec = pl.BlockSpec((TM, K), lambda c, i: (c * tiles_per_split + i, 0))
    w_spec = pl.BlockSpec((K, Cpad), lambda c, i: (0, 0))
    y_spec1 = pl.BlockSpec((TM, Cpad), lambda c, i: (c * tiles_per_split + i, 0))
    stat_spec1 = pl.BlockSpec((SUBLANES, Cpad), lambda c, i: (c, 0))

    y_cache, s1, s2 = pl.pallas_call(
        _matmul_stats_kernel,
        out_shape=(jax.ShapeDtypeStruct((M_pad, Cpad), jnp.bfloat16),
                   jax.ShapeDtypeStruct((nsplit * SUBLANES, Cpad), jnp.float32),
                   jax.ShapeDtypeStruct((nsplit * SUBLANES, Cpad), jnp.float32)),
        grid=(nsplit, tiles_per_split),
        in_specs=[x_spec, w_spec],
        out_specs=(y_spec1, stat_spec1, stat_spec1),
        compiler_params=pltpu.CompilerParams(
            dimension_semantics=("parallel", "arbitrary"),
            vmem_limit_bytes=VMEM_LIMIT),
    )(x_bf, w_bf)

    # ---- pass 2: normalize + affine + ReLU on cached y, tile-parallel ------
    y_spec2 = pl.BlockSpec((TM, Cpad), lambda i: (i, 0))
    stat_spec2 = pl.BlockSpec((nsplit * SUBLANES, Cpad), lambda i: (0, 0))
    vec_spec = pl.BlockSpec((1, Cpad), lambda i: (0, 0))

    out = pl.pallas_call(
        functools.partial(_epilogue_kernel, inv_m=1.0 / M),
        out_shape=jax.ShapeDtypeStruct((M_pad, Cpad), out_dtype),
        grid=(n_tiles,),
        in_specs=[y_spec2, stat_spec2, stat_spec2, vec_spec, vec_spec],
        out_specs=pl.BlockSpec((TM, Cpad), lambda i: (i, 0)),
        compiler_params=pltpu.CompilerParams(
            dimension_semantics=("parallel",),
            vmem_limit_bytes=VMEM_LIMIT),
    )(y_cache, s1, s2, g, b)
    return out


# ---------------------------------------------------------------------------
# MixupBlock forward (two conv+bn+relu stages with channel<->width transposes)
# ---------------------------------------------------------------------------
def mixup_block_forward(x, params):
    N, Cin, H, W = x.shape
    Cout = params["w1"].shape[0]
    Wout1 = W // KW
    assert Wout1 == Cin, "module requires W // 64 == in_channels (for conv2)"
    assert Cout % KW == 0, "module requires out_channels divisible by 64"
    Wout2 = Cout // KW
    x = x[..., : Wout1 * KW]              # drop conv tail (PyTorch VALID semantics)

    # ---- stage 1: conv1 + bn1 + relu ---------------------------------------
    # TODO(synk): replace this XLA im2col copy with a BlockSpec index_map DMA.
    x1 = x.reshape(N, Cin, H, Wout1, KW)
    x1 = jnp.transpose(x1, (0, 2, 3, 1, 4)).reshape(N * H * Wout1, Cin * KW)
    w1 = params["w1"].reshape(Cout, Cin * KW).T
    M1 = N * H * Wout1
    y1 = conv_bn_relu(x1, w1, params["g1"], params["be1"], out_dtype=jnp.bfloat16)
    out1 = y1[:M1, :Cout].reshape(N, H, Wout1, Cout)   # out1[n,h,w1,co] = s1[n,co,h,w1]

    # ---- transpose(1,3) then stage 2: conv2 + bn2 + relu --------------------
    # TODO(synk): fold this transpose + im2col into the stage-2 x index_map.
    x2 = out1.reshape(N, H, Wout1, Wout2, KW)
    x2 = jnp.transpose(x2, (0, 1, 3, 2, 4)).reshape(N * H * Wout2, Cin * KW)
    w2 = params["w2"].reshape(Cout, Cin * KW).T
    M2 = N * H * Wout2
    y2 = conv_bn_relu(x2, w2, params["g2"], params["be2"], out_dtype=jnp.float32)
    out2 = y2[:M2, :Cout].reshape(N, H, Wout2, Cout)   # out2[n,h,w2,co] = s2[n,co,h,w2]

    # ---- final transpose(1,3): (N, Cout, H, Wout2) -> (N, Wout2, H, Cout) ----
    # TODO(synk): write this layout directly from stage-2 pass 2's out_spec.
    return jnp.transpose(out2, (0, 2, 1, 3))


# ---------------------------------------------------------------------------
# Deterministic parameter init (matches PyTorch Conv2d/BatchNorm2d shapes)
# ---------------------------------------------------------------------------
def init_params(key, in_channels, out_channels):
    k1, k2, k3, k4 = jax.random.split(key, 4)
    fan_in = in_channels * KW
    bound = 1.0 / np.sqrt(fan_in)
    return {
        "w1": jax.random.uniform(k1, (out_channels, in_channels, 1, KW),
                                 jnp.float32, -bound, bound),
        "b1": jax.random.uniform(k2, (out_channels,), jnp.float32, -bound, bound),
        "w2": jax.random.uniform(k3, (out_channels, in_channels, 1, KW),
                                 jnp.float32, -bound, bound),
        "b2": jax.random.uniform(k4, (out_channels,), jnp.float32, -bound, bound),
        # BatchNorm2d default affine init: weight=1, bias=0
        "g1": jnp.ones((out_channels,), jnp.float32),
        "be1": jnp.zeros((out_channels,), jnp.float32),
        "g2": jnp.ones((out_channels,), jnp.float32),
        "be2": jnp.zeros((out_channels,), jnp.float32),
    }


# ---------------------------------------------------------------------------
# Pure-JAX reference (mirrors the PyTorch forward, training-mode BN, with bias;
# the conv bias is mathematically absorbed by the BN mean subtraction).
# ---------------------------------------------------------------------------
def reference_forward(x, params):
    def conv(x, w, b):
        y = lax.conv_general_dilated(x, w, window_strides=(1, KW), padding="VALID",
                                     dimension_numbers=("NCHW", "OIHW", "NCHW"))
        return y + b[None, :, None, None]

    def bn_relu(y, g, be):
        mean = jnp.mean(y, axis=(0, 2, 3), keepdims=True)
        var = jnp.mean(jnp.square(y - mean), axis=(0, 2, 3), keepdims=True)
        yhat = (y - mean) / jnp.sqrt(var + BN_EPS)
        return jnp.maximum(yhat * g[None, :, None, None] + be[None, :, None, None], 0.0)

    y = bn_relu(conv(x, params["w1"], params["b1"]), params["g1"], params["be1"])
    y = jnp.transpose(y, (0, 3, 2, 1))          # torch .transpose(1, 3)
    y = bn_relu(conv(y, params["w2"], params["b2"]), params["g2"], params["be2"])
    return jnp.transpose(y, (0, 3, 2, 1))


if __name__ == "__main__":
    in_channels, out_channels = 2, 64
    N, H = 2, 4
    W = KW * in_channels                 # W // 64 must equal in_channels
    key = jax.random.PRNGKey(0)
    kx, kp = jax.random.split(key)
    x = jax.random.normal(kx, (N, in_channels, H, W), jnp.float32)
    params = init_params(kp, in_channels, out_channels)

    fwd = jax.jit(mixup_block_forward)
    out = jax.block_until_ready(fwd(x, params))

    ref = reference_forward(x, params)
    np.testing.assert_allclose(np.asarray(out, dtype=np.float32), np.asarray(ref),
                               rtol=2e-2, atol=2e-2)
    print("KERNEL_OK")
</pallas_src>

<mosaic_0001>
module attributes {stable_mosaic.version = 11 : i64} {
  func.func @_matmul_stats_kernel(%arg0: i32, %arg1: i32, %arg2: memref<16x128xbf16, #tpu.memory_space<vmem>>, %arg3: memref<128x128xbf16, #tpu.memory_space<vmem>>, %arg4: memref<16x128xbf16, #tpu.memory_space<vmem>>, %arg5: memref<8x128xf32, #tpu.memory_space<vmem>>, %arg6: memref<8x128xf32, #tpu.memory_space<vmem>>) attributes {dimension_semantics = [#tpu.dimension_semantics<parallel>, #tpu.dimension_semantics<arbitrary>], iteration_bounds = array<i64: 1, 1>, scalar_prefetch = 0 : i64, scratch_operands = 0 : i64, tpu.core_type = #tpu.core_type<tc>, window_params = [{transform_indices = @transform_0, window_bounds = array<i64: 16, 128>}, {pipeline_mode = #tpu.pipeline_mode<synchronous>, transform_indices = @transform_1, window_bounds = array<i64: 128, 128>}, {transform_indices = @transform_2, window_bounds = array<i64: 16, 128>}, {transform_indices = @transform_3, window_bounds = array<i64: 8, 128>}, {transform_indices = @transform_4, window_bounds = array<i64: 8, 128>}]} {
    %c0_i32 = arith.constant 0 : i32
    %0 = arith.cmpi eq, %arg1, %c0_i32 : i32
    %1 = arith.extui %0 : i1 to i32
    %c0_i32_0 = arith.constant 0 : i32
    %2 = arith.cmpi ne, %1, %c0_i32_0 : i32
    scf.if %2 {
      %cst_16 = arith.constant 0.000000e+00 : f32
      %19 = vector.broadcast %cst_16 : f32 to vector<8x128xf32>
      %c0_17 = arith.constant 0 : index
      %c0_18 = arith.constant 0 : index
      %20 = vector.load %arg5[%c0_17, %c0_18] : memref<8x128xf32, #tpu.memory_space<vmem>>, vector<8x128xf32>
      tpu.vector_store %arg5[%c0_17, %c0_18], %19 {strides = array<i32>} : memref<8x128xf32, #tpu.memory_space<vmem>>, vector<8x128xf32>,
      %cst_19 = arith.constant 0.000000e+00 : f32
      %21 = vector.broadcast %cst_19 : f32 to vector<8x128xf32>
      %c0_20 = arith.constant 0 : index
      %c0_21 = arith.constant 0 : index
      %22 = vector.load %arg6[%c0_20, %c0_21] : memref<8x128xf32, #tpu.memory_space<vmem>>, vector<8x128xf32>
      tpu.vector_store %arg6[%c0_20, %c0_21], %21 {strides = array<i32>} : memref<8x128xf32, #tpu.memory_space<vmem>>, vector<8x128xf32>,
    } else {
    }
    %c0 = arith.constant 0 : index
    %c0_1 = arith.constant 0 : index
    %3 = vector.load %arg2[%c0, %c0_1] : memref<16x128xbf16, #tpu.memory_space<vmem>>, vector<16x128xbf16>
    %c0_2 = arith.constant 0 : index
    %c0_3 = arith.constant 0 : index
    %4 = vector.load %arg3[%c0_2, %c0_3] : memref<128x128xbf16, #tpu.memory_space<vmem>>, vector<128x128xbf16>
    %cst = arith.constant dense<0.000000e+00> : vector<16x128xf32>
    %5 = tpu.matmul %3, %4, %cst {dimension_numbers = #tpu.dot_dimension_numbers<[1], [0], [0], [1], [0, 0, 1, 1], [], []>} : vector<16x128xbf16>, vector<128x128xbf16>, vector<16x128xf32> -> vector<16x128xf32>
    %6 = arith.truncf %5 : vector<16x128xf32> to vector<16x128xbf16>
    %c0_4 = arith.constant 0 : index
    %c0_5 = arith.constant 0 : index
    %7 = vector.load %arg4[%c0_4, %c0_5] : memref<16x128xbf16, #tpu.memory_space<vmem>>, vector<16x128xbf16>
    tpu.vector_store %arg4[%c0_4, %c0_5], %6 {strides = array<i32>} : memref<16x128xbf16, #tpu.memory_space<vmem>>, vector<16x128xbf16>,
    %8 = arith.extf %6 : vector<16x128xbf16> to vector<16x128xf32>
    %9 = vector.shape_cast %8 : vector<16x128xf32> to vector<2x8x128xf32>
    %c0_6 = arith.constant 0 : index
    %c0_7 = arith.constant 0 : index
    %10 = vector.load %arg5[%c0_6, %c0_7] : memref<8x128xf32, #tpu.memory_space<vmem>>, vector<8x128xf32>
    %cst_8 = arith.constant dense<0.000000e+00> : vector<8x128xf32>
    %11 = vector.multi_reduction <add>, %9, %cst_8 [0] : vector<2x8x128xf32> to vector<8x128xf32>
    %12 = arith.addf %10, %11 : vector<8x128xf32>
    %c0_9 = arith.constant 0 : index
    %c0_10 = arith.constant 0 : index
    %13 = vector.load %arg5[%c0_9, %c0_10] : memref<8x128xf32, #tpu.memory_space<vmem>>, vector<8x128xf32>
    tpu.vector_store %arg5[%c0_9, %c0_10], %12 {strides = array<i32>} : memref<8x128xf32, #tpu.memory_space<vmem>>, vector<8x128xf32>,
    %c0_11 = arith.constant 0 : index
    %c0_12 = arith.constant 0 : index
    %14 = vector.load %arg6[%c0_11, %c0_12] : memref<8x128xf32, #tpu.memory_space<vmem>>, vector<8x128xf32>
    %15 = arith.mulf %9, %9 : vector<2x8x128xf32>
    %cst_13 = arith.constant dense<0.000000e+00> : vector<8x128xf32>
    %16 = vector.multi_reduction <add>, %15, %cst_13 [0] : vector<2x8x128xf32> to vector<8x128xf32>
    %17 = arith.addf %14, %16 : vector<8x128xf32>
    %c0_14 = arith.constant 0 : index
    %c0_15 = arith.constant 0 : index
    %18 = vector.load %arg6[%c0_14, %c0_15] : memref<8x128xf32, #tpu.memory_space<vmem>>, vector<8x128xf32>
    tpu.vector_store %arg6[%c0_14, %c0_15], %17 {strides = array<i32>} : memref<8x128xf32, #tpu.memory_space<vmem>>, vector<8x128xf32>,
    return
  }
  func.func @transform_0(%arg0: i32, %arg1: i32) -> (i32, i32) {
    %c1_i32 = arith.constant 1 : i32
    %0 = arith.muli %arg0, %c1_i32 : i32
    %1 = arith.addi %0, %arg1 : i32
    %c0_i32 = arith.constant 0 : i32
    %c0_i32_0 = arith.constant 0 : i32
    return %1, %c0_i32 : i32, i32
  }
  func.func @transform_1(%arg0: i32, %arg1: i32) -> (i32, i32) {
    %c0_i32 = arith.constant 0 : i32
    %c0_i32_0 = arith.constant 0 : i32
    %c0_i32_1 = arith.constant 0 : i32
    return %c0_i32, %c0_i32_0 : i32, i32
  }
  func.func @transform_2(%arg0: i32, %arg1: i32) -> (i32, i32) {
    %c1_i32 = arith.constant 1 : i32
    %0 = arith.muli %arg0, %c1_i32 : i32
    %1 = arith.addi %0, %arg1 : i32
    %c0_i32 = arith.constant 0 : i32
    %c0_i32_0 = arith.constant 0 : i32
    return %1, %c0_i32 : i32, i32
  }
  func.func @transform_3(%arg0: i32, %arg1: i32) -> (i32, i32) {
    %c0_i32 = arith.constant 0 : i32
    %c0_i32_0 = arith.constant 0 : i32
    return %arg0, %c0_i32 : i32, i32
  }
  func.func @transform_4(%arg0: i32, %arg1: i32) -> (i32, i32) {
    %c0_i32 = arith.constant 0 : i32
    %c0_i32_0 = arith.constant 0 : i32
    return %arg0, %c0_i32 : i32, i32
  }
}

module attributes {stable_mosaic.version = 11 : i64} {
  func.func @_epilogue_kernel(%arg0: i32, %arg1: memref<16x128xbf16, #tpu.memory_space<vmem>>, %arg2: memref<8x128xf32, #tpu.memory_space<vmem>>, %arg3: memref<8x128xf32, #tpu.memory_space<vmem>>, %arg4: memref<1x128xf32, #tpu.memory_space<vmem>>, %arg5: memref<1x128xf32, #tpu.memory_space<vmem>>, %arg6: memref<16x128xbf16, #tpu.memory_space<vmem>>) attributes {dimension_semantics = [#tpu.dimension_semantics<parallel>], iteration_bounds = array<i64: 1>, scalar_prefetch = 0 : i64, scratch_operands = 0 : i64, tpu.core_type = #tpu.core_type<tc>, window_params = [{transform_indices = @transform_0, window_bounds = array<i64: 16, 128>}, {pipeline_mode = #tpu.pipeline_mode<synchronous>, transform_indices = @transform_1, window_bounds = array<i64: 8, 128>}, {pipeline_mode = #tpu.pipeline_mode<synchronous>, transform_indices = @transform_2, window_bounds = array<i64: 8, 128>}, {pipeline_mode = #tpu.pipeline_mode<synchronous>, transform_indices = @transform_3, window_bounds = array<i64: 1, 128>}, {pipeline_mode = #tpu.pipeline_mode<synchronous>, transform_indices = @transform_4, window_bounds = array<i64: 1, 128>}, {transform_indices = @transform_5, window_bounds = array<i64: 16, 128>}]} {
    %c0 = arith.constant 0 : index
    %c0_0 = arith.constant 0 : index
    %0 = vector.load %arg2[%c0, %c0_0] : memref<8x128xf32, #tpu.memory_space<vmem>>, vector<8x128xf32>
    %cst = arith.constant dense<0.000000e+00> : vector<128xf32>
    %1 = vector.multi_reduction <add>, %0, %cst [0] : vector<8x128xf32> to vector<128xf32>
    %2 = vector.shape_cast %1 : vector<128xf32> to vector<1x128xf32>
    %cst_1 = arith.constant 6.250000e-02 : f32
    %3 = vector.broadcast %cst_1 : f32 to vector<1x128xf32>
    %4 = arith.mulf %2, %3 : vector<1x128xf32>
    %c0_2 = arith.constant 0 : index
    %c0_3 = arith.constant 0 : index
    %5 = vector.load %arg3[%c0_2, %c0_3] : memref<8x128xf32, #tpu.memory_space<vmem>>, vector<8x128xf32>
    %cst_4 = arith.constant dense<0.000000e+00> : vector<128xf32>
    %6 = vector.multi_reduction <add>, %5, %cst_4 [0] : vector<8x128xf32> to vector<128xf32>
    %7 = vector.shape_cast %6 : vector<128xf32> to vector<1x128xf32>
    %cst_5 = arith.constant 6.250000e-02 : f32
    %8 = vector.broadcast %cst_5 : f32 to vector<1x128xf32>
    %9 = arith.mulf %7, %8 : vector<1x128xf32>
    %10 = arith.mulf %4, %4 : vector<1x128xf32>
    %11 = arith.subf %9, %10 : vector<1x128xf32>
    %cst_6 = arith.constant 0.000000e+00 : f32
    %12 = vector.broadcast %cst_6 : f32 to vector<1x128xf32>
    %13 = arith.maximumf %11, %12 : vector<1x128xf32>
    %c0_7 = arith.constant 0 : index
    %c0_8 = arith.constant 0 : index
    %14 = vector.load %arg4[%c0_7, %c0_8] : memref<1x128xf32, #tpu.memory_space<vmem>>, vector<1x128xf32>
    %cst_9 = arith.constant 9.99999974E-6 : f32
    %15 = vector.broadcast %cst_9 : f32 to vector<1x128xf32>
    %16 = arith.addf %13, %15 : vector<1x128xf32>
    %17 = math.rsqrt %16 : vector<1x128xf32>
    %18 = arith.mulf %14, %17 : vector<1x128xf32>
    %c0_10 = arith.constant 0 : index
    %c0_11 = arith.constant 0 : index
    %19 = vector.load %arg5[%c0_10, %c0_11] : memref<1x128xf32, #tpu.memory_space<vmem>>, vector<1x128xf32>
    %20 = arith.mulf %4, %18 : vector<1x128xf32>
    %21 = arith.subf %19, %20 : vector<1x128xf32>
    %c0_12 = arith.constant 0 : index
    %c0_13 = arith.constant 0 : index
    %22 = vector.load %arg1[%c0_12, %c0_13] : memref<16x128xbf16, #tpu.memory_space<vmem>>, vector<16x128xbf16>
    %23 = arith.extf %22 : vector<16x128xbf16> to vector<16x128xf32>
    %24 = vector.broadcast %18 : vector<1x128xf32> to vector<16x128xf32>
    %25 = arith.mulf %23, %24 : vector<16x128xf32>
    %26 = vector.broadcast %21 : vector<1x128xf32> to vector<16x128xf32>
    %27 = arith.addf %25, %26 : vector<16x128xf32>
    %cst_14 = arith.constant 0.000000e+00 : f32
    %28 = vector.broadcast %cst_14 : f32 to vector<16x128xf32>
    %29 = arith.maximumf %27, %28 : vector<16x128xf32>
    %30 = arith.truncf %29 : vector<16x128xf32> to vector<16x128xbf16>
    %c0_15 = arith.constant 0 : index
    %c0_16 = arith.constant 0 : index
    %31 = vector.load %arg6[%c0_15, %c0_16] : memref<16x128xbf16, #tpu.memory_space<vmem>>, vector<16x128xbf16>
    tpu.vector_store %arg6[%c0_15, %c0_16], %30 {strides = array<i32>} : memref<16x128xbf16, #tpu.memory_space<vmem>>, vector<16x128xbf16>,
    return
  }
  func.func @transform_0(%arg0: i32) -> (i32, i32) {
    %c0_i32 = arith.constant 0 : i32
    %c0_i32_0 = arith.constant 0 : i32
    return %arg0, %c0_i32 : i32, i32
  }
  func.func @transform_1(%arg0: i32) -> (i32, i32) {
    %c0_i32 = arith.constant 0 : i32
    %c0_i32_0 = arith.constant 0 : i32
    %c0_i32_1 = arith.constant 0 : i32
    return %c0_i32, %c0_i32_0 : i32, i32
  }
  func.func @transform_2(%arg0: i32) -> (i32, i32) {
    %c0_i32 = arith.constant 0 : i32
    %c0_i32_0 = arith.constant 0 : i32
    %c0_i32_1 = arith.constant 0 : i32
    return %c0_i32, %c0_i32_0 : i32, i32
  }
  func.func @transform_3(%arg0: i32) -> (i32, i32) {
    %c0_i32 = arith.constant 0 : i32
    %c0_i32_0 = arith.constant 0 : i32
    %c0_i32_1 = arith.constant 0 : i32
    return %c0_i32, %c0_i32_0 : i32, i32
  }
  func.func @transform_4(%arg0: i32) -> (i32, i32) {
    %c0_i32 = arith.constant 0 : i32
    %c0_i32_0 = arith.constant 0 : i32
    %c0_i32_1 = arith.constant 0 : i32
    return %c0_i32, %c0_i32_0 : i32, i32
  }
  func.func @transform_5(%arg0: i32) -> (i32, i32) {
    %c0_i32 = arith.constant 0 : i32
    %c0_i32_0 = arith.constant 0 : i32
    return %arg0, %c0_i32 : i32, i32
  }
}

module attributes {stable_mosaic.version = 11 : i64} {
  func.func @_matmul_stats_kernel(%arg0: i32, %arg1: i32, %arg2: memref<8x128xbf16, #tpu.memory_space<vmem>>, %arg3: memref<128x128xbf16, #tpu.memory_space<vmem>>, %arg4: memref<8x128xbf16, #tpu.memory_space<vmem>>, %arg5: memref<8x128xf32, #tpu.memory_space<vmem>>, %arg6: memref<8x128xf32, #tpu.memory_space<vmem>>) attributes {dimension_semantics = [#tpu.dimension_semantics<parallel>, #tpu.dimension_semantics<arbitrary>], iteration_bounds = array<i64: 1, 1>, scalar_prefetch = 0 : i64, scratch_operands = 0 : i64, tpu.core_type = #tpu.core_type<tc>, window_params = [{transform_indices = @transform_0, window_bounds = array<i64: 8, 128>}, {pipeline_mode = #tpu.pipeline_mode<synchronous>, transform_indices = @transform_1, window_bounds = array<i64: 128, 128>}, {transform_indices = @transform_2, window_bounds = array<i64: 8, 128>}, {transform_indices = @transform_3, window_bounds = array<i64: 8, 128>}, {transform_indices = @transform_4, window_bounds = array<i64: 8, 128>}]} {
    %c0_i32 = arith.constant 0 : i32
    %0 = arith.cmpi eq, %arg1, %c0_i32 : i32
    %1 = arith.extui %0 : i1 to i32
    %c0_i32_0 = arith.constant 0 : i32
    %2 = arith.cmpi ne, %1, %c0_i32_0 : i32
    scf.if %2 {
      %cst_16 = arith.constant 0.000000e+00 : f32
      %19 = vector.broadcast %cst_16 : f32 to vector<8x128xf32>
      %c0_17 = arith.constant 0 : index
      %c0_18 = arith.constant 0 : index
      %20 = vector.load %arg5[%c0_17, %c0_18] : memref<8x128xf32, #tpu.memory_space<vmem>>, vector<8x128xf32>
      tpu.vector_store %arg5[%c0_17, %c0_18], %19 {strides = array<i32>} : memref<8x128xf32, #tpu.memory_space<vmem>>, vector<8x128xf32>,
      %cst_19 = arith.constant 0.000000e+00 : f32
      %21 = vector.broadcast %cst_19 : f32 to vector<8x128xf32>
      %c0_20 = arith.constant 0 : index
      %c0_21 = arith.constant 0 : index
      %22 = vector.load %arg6[%c0_20, %c0_21] : memref<8x128xf32, #tpu.memory_space<vmem>>, vector<8x128xf32>
      tpu.vector_store %arg6[%c0_20, %c0_21], %21 {strides = array<i32>} : memref<8x128xf32, #tpu.memory_space<vmem>>, vector<8x128xf32>,
    } else {
    }
    %c0 = arith.constant 0 : index
    %c0_1 = arith.constant 0 : index
    %3 = vector.load %arg2[%c0, %c0_1] : memref<8x128xbf16, #tpu.memory_space<vmem>>, vector<8x128xbf16>
    %c0_2 = arith.constant 0 : index
    %c0_3 = arith.constant 0 : index
    %4 = vector.load %arg3[%c0_2, %c0_3] : memref<128x128xbf16, #tpu.memory_space<vmem>>, vector<128x128xbf16>
    %cst = arith.constant dense<0.000000e+00> : vector<8x128xf32>
    %5 = tpu.matmul %3, %4, %cst {dimension_numbers = #tpu.dot_dimension_numbers<[1], [0], [0], [1], [0, 0, 1, 1], [], []>} : vector<8x128xbf16>, vector<128x128xbf16>, vector<8x128xf32> -> vector<8x128xf32>
    %6 = arith.truncf %5 : vector<8x128xf32> to vector<8x128xbf16>
    %c0_4 = arith.constant 0 : index
    %c0_5 = arith.constant 0 : index
    %7 = vector.load %arg4[%c0_4, %c0_5] : memref<8x128xbf16, #tpu.memory_space<vmem>>, vector<8x128xbf16>
    tpu.vector_store %arg4[%c0_4, %c0_5], %6 {strides = array<i32>} : memref<8x128xbf16, #tpu.memory_space<vmem>>, vector<8x128xbf16>,
    %8 = arith.extf %6 : vector<8x128xbf16> to vector<8x128xf32>
    %9 = vector.shape_cast %8 : vector<8x128xf32> to vector<1x8x128xf32>
    %c0_6 = arith.constant 0 : index
    %c0_7 = arith.constant 0 : index
    %10 = vector.load %arg5[%c0_6, %c0_7] : memref<8x128xf32, #tpu.memory_space<vmem>>, vector<8x128xf32>
    %cst_8 = arith.constant dense<0.000000e+00> : vector<8x128xf32>
    %11 = vector.multi_reduction <add>, %9, %cst_8 [0] : vector<1x8x128xf32> to vector<8x128xf32>
    %12 = arith.addf %10, %11 : vector<8x128xf32>
    %c0_9 = arith.constant 0 : index
    %c0_10 = arith.constant 0 : index
    %13 = vector.load %arg5[%c0_9, %c0_10] : memref<8x128xf32, #tpu.memory_space<vmem>>, vector<8x128xf32>
    tpu.vector_store %arg5[%c0_9, %c0_10], %12 {strides = array<i32>} : memref<8x128xf32, #tpu.memory_space<vmem>>, vector<8x128xf32>,
    %c0_11 = arith.constant 0 : index
    %c0_12 = arith.constant 0 : index
    %14 = vector.load %arg6[%c0_11, %c0_12] : memref<8x128xf32, #tpu.memory_space<vmem>>, vector<8x128xf32>
    %15 = arith.mulf %9, %9 : vector<1x8x128xf32>
    %cst_13 = arith.constant dense<0.000000e+00> : vector<8x128xf32>
    %16 = vector.multi_reduction <add>, %15, %cst_13 [0] : vector<1x8x128xf32> to vector<8x128xf32>
    %17 = arith.addf %14, %16 : vector<8x128xf32>
    %c0_14 = arith.constant 0 : index
    %c0_15 = arith.constant 0 : index
    %18 = vector.load %arg6[%c0_14, %c0_15] : memref<8x128xf32, #tpu.memory_space<vmem>>, vector<8x128xf32>
    tpu.vector_store %arg6[%c0_14, %c0_15], %17 {strides = array<i32>} : memref<8x128xf32, #tpu.memory_space<vmem>>, vector<8x128xf32>,
    return
  }
  func.func @transform_0(%arg0: i32, %arg1: i32) -> (i32, i32) {
    %c1_i32 = arith.constant 1 : i32
    %0 = arith.muli %arg0, %c1_i32 : i32
    %1 = arith.addi %0, %arg1 : i32
    %c0_i32 = arith.constant 0 : i32
    %c0_i32_0 = arith.constant 0 : i32
    return %1, %c0_i32 : i32, i32
  }
  func.func @transform_1(%arg0: i32, %arg1: i32) -> (i32, i32) {
    %c0_i32 = arith.constant 0 : i32
    %c0_i32_0 = arith.constant 0 : i32
    %c0_i32_1 = arith.constant 0 : i32
    return %c0_i32, %c0_i32_0 : i32, i32
  }
  func.func @transform_2(%arg0: i32, %arg1: i32) -> (i32, i32) {
    %c1_i32 = arith.constant 1 : i32
    %0 = arith.muli %arg0, %c1_i32 : i32
    %1 = arith.addi %0, %arg1 : i32
    %c0_i32 = arith.constant 0 : i32
    %c0_i32_0 = arith.constant 0 : i32
    return %1, %c0_i32 : i32, i32
  }
  func.func @transform_3(%arg0: i32, %arg1: i32) -> (i32, i32) {
    %c0_i32 = arith.constant 0 : i32
    %c0_i32_0 = arith.constant 0 : i32
    return %arg0, %c0_i32 : i32, i32
  }
  func.func @transform_4(%arg0: i32, %arg1: i32) -> (i32, i32) {
    %c0_i32 = arith.constant 0 : i32
    %c0_i32_0 = arith.constant 0 : i32
    return %arg0, %c0_i32 : i32, i32
  }
}

module attributes {stable_mosaic.version = 11 : i64} {
  func.func @_epilogue_kernel(%arg0: i32, %arg1: memref<8x128xbf16, #tpu.memory_space<vmem>>, %arg2: memref<8x128xf32, #tpu.memory_space<vmem>>, %arg3: memref<8x128xf32, #tpu.memory_space<vmem>>, %arg4: memref<1x128xf32, #tpu.memory_space<vmem>>, %arg5: memref<1x128xf32, #tpu.memory_space<vmem>>, %arg6: memref<8x128xf32, #tpu.memory_space<vmem>>) attributes {dimension_semantics = [#tpu.dimension_semantics<parallel>], iteration_bounds = array<i64: 1>, scalar_prefetch = 0 : i64, scratch_operands = 0 : i64, tpu.core_type = #tpu.core_type<tc>, window_params = [{transform_indices = @transform_0, window_bounds = array<i64: 8, 128>}, {pipeline_mode = #tpu.pipeline_mode<synchronous>, transform_indices = @transform_1, window_bounds = array<i64: 8, 128>}, {pipeline_mode = #tpu.pipeline_mode<synchronous>, transform_indices = @transform_2, window_bounds = array<i64: 8, 128>}, {pipeline_mode = #tpu.pipeline_mode<synchronous>, transform_indices = @transform_3, window_bounds = array<i64: 1, 128>}, {pipeline_mode = #tpu.pipeline_mode<synchronous>, transform_indices = @transform_4, window_bounds = array<i64: 1, 128>}, {transform_indices = @transform_5, window_bounds = array<i64: 8, 128>}]} {
    %c0 = arith.constant 0 : index
    %c0_0 = arith.constant 0 : index
    %0 = vector.load %arg2[%c0, %c0_0] : memref<8x128xf32, #tpu.memory_space<vmem>>, vector<8x128xf32>
    %cst = arith.constant dense<0.000000e+00> : vector<128xf32>
    %1 = vector.multi_reduction <add>, %0, %cst [0] : vector<8x128xf32> to vector<128xf32>
    %2 = vector.shape_cast %1 : vector<128xf32> to vector<1x128xf32>
    %cst_1 = arith.constant 1.250000e-01 : f32
    %3 = vector.broadcast %cst_1 : f32 to vector<1x128xf32>
    %4 = arith.mulf %2, %3 : vector<1x128xf32>
    %c0_2 = arith.constant 0 : index
    %c0_3 = arith.constant 0 : index
    %5 = vector.load %arg3[%c0_2, %c0_3] : memref<8x128xf32, #tpu.memory_space<vmem>>, vector<8x128xf32>
    %cst_4 = arith.constant dense<0.000000e+00> : vector<128xf32>
    %6 = vector.multi_reduction <add>, %5, %cst_4 [0] : vector<8x128xf32> to vector<128xf32>
    %7 = vector.shape_cast %6 : vector<128xf32> to vector<1x128xf32>
    %cst_5 = arith.constant 1.250000e-01 : f32
    %8 = vector.broadcast %cst_5 : f32 to vector<1x128xf32>
    %9 = arith.mulf %7, %8 : vector<1x128xf32>
    %10 = arith.mulf %4, %4 : vector<1x128xf32>
    %11 = arith.subf %9, %10 : vector<1x128xf32>
    %cst_6 = arith.constant 0.000000e+00 : f32
    %12 = vector.broadcast %cst_6 : f32 to vector<1x128xf32>
    %13 = arith.maximumf %11, %12 : vector<1x128xf32>
    %c0_7 = arith.constant 0 : index
    %c0_8 = arith.constant 0 : index
    %14 = vector.load %arg4[%c0_7, %c0_8] : memref<1x128xf32, #tpu.memory_space<vmem>>, vector<1x128xf32>
    %cst_9 = arith.constant 9.99999974E-6 : f32
    %15 = vector.broadcast %cst_9 : f32 to vector<1x128xf32>
    %16 = arith.addf %13, %15 : vector<1x128xf32>
    %17 = math.rsqrt %16 : vector<1x128xf32>
    %18 = arith.mulf %14, %17 : vector<1x128xf32>
    %c0_10 = arith.constant 0 : index
    %c0_11 = arith.constant 0 : index
    %19 = vector.load %arg5[%c0_10, %c0_11] : memref<1x128xf32, #tpu.memory_space<vmem>>, vector<1x128xf32>
    %20 = arith.mulf %4, %18 : vector<1x128xf32>
    %21 = arith.subf %19, %20 : vector<1x128xf32>
    %c0_12 = arith.constant 0 : index
    %c0_13 = arith.constant 0 : index
    %22 = vector.load %arg1[%c0_12, %c0_13] : memref<8x128xbf16, #tpu.memory_space<vmem>>, vector<8x128xbf16>
    %23 = arith.extf %22 : vector<8x128xbf16> to vector<8x128xf32>
    %24 = vector.broadcast %18 : vector<1x128xf32> to vector<8x128xf32>
    %25 = arith.mulf %23, %24 : vector<8x128xf32>
    %26 = vector.broadcast %21 : vector<1x128xf32> to vector<8x128xf32>
    %27 = arith.addf %25, %26 : vector<8x128xf32>
    %cst_14 = arith.constant 0.000000e+00 : f32
    %28 = vector.broadcast %cst_14 : f32 to vector<8x128xf32>
    %29 = arith.maximumf %27, %28 : vector<8x128xf32>
    %c0_15 = arith.constant 0 : index
    %c0_16 = arith.constant 0 : index
    %30 = vector.load %arg6[%c0_15, %c0_16] : memref<8x128xf32, #tpu.memory_space<vmem>>, vector<8x128xf32>
    tpu.vector_store %arg6[%c0_15, %c0_16], %29 {strides = array<i32>} : memref<8x128xf32, #tpu.memory_space<vmem>>, vector<8x128xf32>,
    return
  }
  func.func @transform_0(%arg0: i32) -> (i32, i32) {
    %c0_i32 = arith.constant 0 : i32
    %c0_i32_0 = arith.constant 0 : i32
    return %arg0, %c0_i32 : i32, i32
  }
  func.func @transform_1(%arg0: i32) -> (i32, i32) {
    %c0_i32 = arith.constant 0 : i32
    %c0_i32_0 = arith.constant 0 : i32
    %c0_i32_1 = arith.constant 0 : i32
    return %c0_i32, %c0_i32_0 : i32, i32
  }
  func.func @transform_2(%arg0: i32) -> (i32, i32) {
    %c0_i32 = arith.constant 0 : i32
    %c0_i32_0 = arith.constant 0 : i32
    %c0_i32_1 = arith.constant 0 : i32
    return %c0_i32, %c0_i32_0 : i32, i32
  }
  func.func @transform_3(%arg0: i32) -> (i32, i32) {
    %c0_i32 = arith.constant 0 : i32
    %c0_i32_0 = arith.constant 0 : i32
    %c0_i32_1 = arith.constant 0 : i32
    return %c0_i32, %c0_i32_0 : i32, i32
  }
  func.func @transform_4(%arg0: i32) -> (i32, i32) {
    %c0_i32 = arith.constant 0 : i32
    %c0_i32_0 = arith.constant 0 : i32
    %c0_i32_1 = arith.constant 0 : i32
    return %c0_i32, %c0_i32_0 : i32, i32
  }
  func.func @transform_5(%arg0: i32) -> (i32, i32) {
    %c0_i32 = arith.constant 0 : i32
    %c0_i32_0 = arith.constant 0 : i32
    return %arg0, %c0_i32 : i32, i32
  }
}

</mosaic_0001>

<bundles_post_ra>
// kernel: mixup_block_forward.6
= control target key start
LH: loop header
LB: loop body
LE: loop exit
PB: predicated region body
PF: predicated region fallthrough
CT: control target
= control target key end

     0   :  { %v250_v0 = vmov 0.0   ;;  %vm251_vm0 = vmmov 0   ;;  %s313_s1 = inlined_call_operand.vmem [shape: bf16[128,128], index: 1, kind: input, shape index: {}]   ;;  %s314_s0 = inlined_call_operand.vmem [shape: bf16[8,128], index: 0, kind: input, shape index: {}]   ;;  %s315_s2 = inlined_call_operand.vmem [shape: bf16[8,128], index: 2, kind: output, shape index: {0}]   ;;  %s316_s3 = inlined_call_operand.vmem [shape: f32[8,128], index: 3, kind: output, shape index: {1}]   ;;  %s317_s4 = inlined_call_operand.vmem [shape: f32[8,128], index: 4, kind: output, shape index: {2}]  }
   0x1   :  { %220 = vmatprep.subr.bf16.mxu0 %v250_v0  ;;  %v242_v1 = vld [vmem:[%s313_s1] sm:$0xff]   ;;  %236 = vmatprep.mubr.msk.bf16.mxu0 %vm251_vm0, %v250_v0  ;;  %v243_v2 = vld [vmem:[%s313_s1 + $0x8] sm:$0xff]   ;;  %v244_v3 = vld [vmem:[%s313_s1 + $0x10] sm:$0xff]  }
   0x2   :  { %221 = vmatpush3.bf16.msra.mxu0 %v242_v1  ;;  %v245_v4 = vld [vmem:[%s313_s1 + $0x18] sm:$0xff]   ;;  %v246_v5 = vld [vmem:[%s313_s1 + $0x20] sm:$0xff]   ;;  %v247_v6 = vld [vmem:[%s313_s1 + $0x28] sm:$0xff]  }
   0x3   :  { %222 = vmatprep.subr.bf16.mxu0 %v250_v0  ;;  %v248_v7 = vld [vmem:[%s313_s1 + $0x30] sm:$0xff]   ;;  %v249_v8 = vld [vmem:[%s313_s1 + $0x38] sm:$0xff]   ;;  %v49_v9 = vld [vmem:[%s314_s0] sm:$0xf] }
   0x6   :  { %223 = vmatpush3.bf16.msra.mxu0 %v243_v2 }
   0x7   :  { %224 = vmatprep.subr.bf16.mxu0 %v250_v0 }
   0xa   :  { %225 = vmatpush3.bf16.msra.mxu0 %v244_v3 }
   0xb   :  { %226 = vmatprep.subr.bf16.mxu0 %v250_v0 }
   0xe   :  { %227 = vmatpush3.bf16.msra.mxu0 %v245_v4 }
   0xf   :  { %228 = vmatprep.subr.bf16.mxu0 %v250_v0 }
  0x12   :  { %229 = vmatpush3.bf16.msra.mxu0 %v246_v5 }
  0x13   :  { %230 = vmatprep.subr.bf16.mxu0 %v250_v0 }
  0x16   :  { %231 = vmatpush3.bf16.msra.mxu0 %v247_v6 }
  0x17   :  { %232 = vmatprep.subr.bf16.mxu0 %v250_v0 }
  0x1a   :  { %233 = vmatpush3.bf16.msra.mxu0 %v248_v7 }
  0x1b   :  { %234 = vmatprep.subr.bf16.mxu0 %v250_v0 }
  0x1e   :  { %235 = vmatpush3.bf16.msra.mxu0 %v249_v8 }
  0x21   :  { %237 = vmatmul.mubr.bf16.vlgmr.msra.gmra.mrb[0].mxu0 %v49_v9 }
  0xf4   :  { %v148_v10 = vpop.f32.mrb[0].mxu0 }
  0xf5   :  { %v154_v11 = vpack.c.bf16 %v148_v10, %v148_v10  ;;  %v238_v12 = vpop.f32.mrb[1].mxu0 }
  0xf6   :  { %v151_v13 = vpop.f32.mrb[2].mxu0 }
  0xf7   :  { %155 = vst [vmem:[%s315_s2] sm:$0xf] %v154_v11  ;;  %v156_v14 = vunpack.c.l.bf16 %v154_v11  ;;  %v239_v15 = vpop.f32.mrb[3].mxu0 }
  0xf9   :  { %v162_v16 = vmul.f32 %v156_v14, %v156_v14  ;;  %160 = vst [vmem:[%s316_s3] sm:$0xff] %v156_v14 }
  0xfb   :  { %165 = vst [vmem:[%s317_s4] sm:$0xff] %v162_v16 }

// kernel: mixup_block_forward.7
= control target key start
LH: loop header
LB: loop body
LE: loop exit
PB: predicated region body
PF: predicated region fallthrough
CT: control target
= control target key end

     0   :  { %s164_s0 = inlined_call_operand.vmem [shape: bf16[8,128], index: 0, kind: input, shape index: {}]   ;;  %s165_s1 = inlined_call_operand.vmem [shape: f32[8,128], index: 1, kind: input, shape index: {}]   ;;  %s166_s2 = inlined_call_operand.vmem [shape: f32[8,128], index: 2, kind: input, shape index: {}]   ;;  %s167_s3 = inlined_call_operand.vmem [shape: f32[1,128], index: 3, kind: input, shape index: {}]   ;;  %s168_s4 = inlined_call_operand.vmem [shape: f32[1,128], index: 4, kind: input, shape index: {}]   ;;  %s169_s5 = inlined_call_operand.hbm [shape: f32[8,128], index: 5, kind: output, shape index: {}]  }
   0x1   :  { %v21_v0 = vld [vmem:[%s165_s1] sm:$0xff] }
   0x2   :  { %v29_v1 = vld [vmem:[%s166_s2] sm:$0xff]  ;;  %v22_v2 = vrot.slane %v21_v0, 4 }
   0x3   :  { %v30_v3 = vrot.slane %v29_v1, 4 }
   0x4   :  { %10 = vsyncpa [#allocation3], 0  ;;  %v23_v4 = vadd.f32 %v22_v2, %v21_v0  ;;  %v50_v20 = vlaneseq  ;;  %v40_v22 = vld [vmem:[%s167_s3] sm:$0x1]  ;;  %s106_s26 = smov [#allocation2]  }
   0x5   :  { %v31_v5 = vadd.f32 %v30_v3, %v29_v1  ;;  %v47_v23 = vld [vmem:[%s164_s0] sm:$0xf]  ;;  %s71_s27 = sshll.u32 %s106_s26, 4  ;;  %s72_s27 = int_to_ptr.vmem [resolvable:$true] %s71_s27 }
   0x6   :  { %v24_v6 = vrot.slane %v23_v4, 2  ;;  %v51_v21 = vshrl.u32 %v50_v20, 7  ;;  %v48_v27 = vunpack.c.l.bf16 %v47_v23  ;;  %v44_v28 = vld [vmem:[%s168_s4] sm:$0x1]  ;;  %s82_s0 = scalar_lea.vmem %s72_s27, 128  ;;  %p87_p1 = scmp.lt.s32.totalorder %s72_s27, %s72_s27 }
   0x7   :  { %v32_v7 = vrot.slane %v31_v5, 2  ;;  %p83_p0 = scmp.ne.s32.totalorder %s72_s27, %s82_s0  ;;  %p88_p2 = scmp.lt.s32.totalorder %s82_s0, %s82_s0 }
   0x8   :  { %v25_v8 = vadd.f32 %v24_v6, %v23_v4  ;;  %v52_v24 = vsub.s32 0, %v51_v21 }
   0x9   :  { %v33_v9 = vadd.f32 %v32_v7, %v31_v5  ;;  %p89_p3 = por %p88_p2, %p87_p1 }
   0xa   :  { %v26_v10 = vrot.slane %v25_v8, 1 }
   0xb   :  { %v34_v11 = vrot.slane %v33_v9, 1  ;;  %p90_p4 = pnand %p89_p3, %p83_p0 }
   0xc   :  { %v27_v12 = vadd.f32 %v26_v10, %v25_v8 }
   0xd   :  { %v35_v13 = vadd.f32 %v34_v11, %v33_v9 }
   0xe   :  { %v28_v14 = vmul.f32 0.125, %v27_v12 }
   0xf   :  { %v36_v15 = vmul.f32 0.125, %v35_v13 }
  0x10   :  { %v37_v16 = vmul.f32 %v28_v14, %v28_v14 }
  0x12   :  { %v38_v17 = vsub.f32 %v36_v15, %v37_v16 }
  0x14   :  { %v39_v18 = vmax.f32 %v38_v17, 0.0 }
  0x16   :  { %v41_v19 = vadd.f32 1e-05, %v39_v18 }
  0x18   :  { %80 = vrsqrt.f32 %v41_v19 }
  0x22   :  { %v81_v25 = vpop.eup %80 }
  0x23   :  { %v43_v26 = vmul.f32 %v81_v25, %v40_v22 }
  0x25   :  { %v45_v29 = vmul.f32 %v43_v26, %v28_v14  ;;  %v53_v30 = vrot.slane %v43_v26, %v52_v24 }
  0x27   :  { %v46_v31 = vsub.f32 %v44_v28, %v45_v29  ;;  %v55_v32 = vmul.f32 %v53_v30, %v48_v27 }
  0x29   :  { %v60_v33 = vrot.slane %v46_v31, %v52_v24 }
  0x2b   :  { %v62_v34 = vadd.f32 %v60_v33, %v55_v32 }
  0x2d   :  { %v63_v35 = vmax.f32 %v62_v34, 0.0 }
  0x2f   :  { %64 = vst [vmem:[#allocation2] sm:$0xff] %v63_v35 }
  0x30   :  { %93 = shalt.err (!%p90_p4)
}
  0x31   :  { %s94_s28 = scalar_lea.hbm %s169_s5, 128 }
  0x32   :  { %p95_p5 = scmp.ne.s32.totalorder %s169_s5, %s94_s28  ;;  %p98_p6 = scmp.lt.u32.totalorder %s94_s28, %s169_s5 }
  0x34   :  { %p100_p7 = pnand %p98_p6, %p95_p5 }
  0x36   :  { %103 = shalt.err (!%p100_p7)
}
  0x37   :  { %74 = dma.vmem_to_hbm [thread:$0]  %s72_s27, 128, %s169_s5, [#allocation3]  }
  0x38   :  { %104 = dma.done.wait [#allocation3], 128  }
  0x39   :  { %105 = vsyncadd [#allocation3], 4294967168 }
  0x3a   :  { %78 = vsyncpa [#allocation3], 1 }

// kernel: mixup_block_forward.5
= control target key start
LH: loop header
LB: loop body
LE: loop exit
PB: predicated region body
PF: predicated region fallthrough
CT: control target
= control target key end

     0   :  { %v51_v20 = vlaneseq  ;;  %s145_s1 = inlined_call_operand.vmem [shape: f32[8,128], index: 1, kind: input, shape index: {}]   ;;  %s146_s2 = inlined_call_operand.vmem [shape: f32[8,128], index: 2, kind: input, shape index: {}]   ;;  %s147_s0 = inlined_call_operand.vmem [shape: bf16[16,128], index: 0, kind: input, shape index: {}]   ;;  %s148_s3 = inlined_call_operand.vmem [shape: f32[1,128], index: 3, kind: input, shape index: {}]   ;;  %s149_s4 = inlined_call_operand.vmem [shape: f32[1,128], index: 4, kind: input, shape index: {}]   ;;  %s150_s5 = inlined_call_operand.vmem [shape: bf16[16,128], index: 5, kind: output, shape index: {}]  }
   0x1   :  { %v20_v0 = vld [vmem:[%s145_s1] sm:$0xff] }
   0x2   :  { %v28_v1 = vld [vmem:[%s146_s2] sm:$0xff]  ;;  %v21_v2 = vrot.slane %v20_v0, 4  ;;  %v52_v21 = vshrl.u32 %v51_v20, 7 }
   0x3   :  { %v29_v3 = vrot.slane %v28_v1, 4  ;;  %v39_v22 = vld [vmem:[%s148_s3] sm:$0x1] }
   0x4   :  { %v22_v4 = vadd.f32 %v21_v2, %v20_v0  ;;  %v87_v23 = vld [vmem:[%s147_s0] sm:$0xff]   ;;  %v53_v24 = vsub.s32 0, %v52_v21 }
   0x5   :  { %v30_v5 = vadd.f32 %v29_v3, %v28_v1  ;;  %v88_v27 = vunpack.c.l.bf16 %v87_v23  ;;  %v89_v28 = vunpack.c.h.bf16 %v87_v23  ;;  %v43_v29 = vld [vmem:[%s149_s4] sm:$0x1] }
   0x6   :  { %v23_v6 = vrot.slane %v22_v4, 2 }
   0x7   :  { %v31_v7 = vrot.slane %v30_v5, 2 }
   0x8   :  { %v24_v8 = vadd.f32 %v23_v6, %v22_v4 }
   0x9   :  { %v32_v9 = vadd.f32 %v31_v7, %v30_v5 }
   0xa   :  { %v25_v10 = vrot.slane %v24_v8, 1 }
   0xb   :  { %v33_v11 = vrot.slane %v32_v9, 1 }
   0xc   :  { %v26_v12 = vadd.f32 %v25_v10, %v24_v8 }
   0xd   :  { %v34_v13 = vadd.f32 %v33_v11, %v32_v9 }
   0xe   :  { %v27_v14 = vmul.f32 0.0625, %v26_v12 }
   0xf   :  { %v35_v15 = vmul.f32 0.0625, %v34_v13 }
  0x10   :  { %v36_v16 = vmul.f32 %v27_v14, %v27_v14 }
  0x12   :  { %v37_v17 = vsub.f32 %v35_v15, %v36_v16 }
  0x14   :  { %v38_v18 = vmax.f32 %v37_v17, 0.0 }
  0x16   :  { %v40_v19 = vadd.f32 1e-05, %v38_v18 }
  0x18   :  { %95 = vrsqrt.f32 %v40_v19 }
  0x22   :  { %v96_v25 = vpop.eup %95 }
  0x23   :  { %v42_v26 = vmul.f32 %v96_v25, %v39_v22 }
  0x25   :  { %v44_v30 = vmul.f32 %v42_v26, %v27_v14  ;;  %v54_v31 = vrot.slane %v42_v26, %v53_v24 }
  0x27   :  { %v45_v32 = vsub.f32 %v43_v29, %v44_v30  ;;  %v56_v33 = vmul.f32 %v88_v27, %v54_v31  ;;  %v57_v34 = vmul.f32 %v89_v28, %v54_v31 }
  0x29   :  { %v62_v35 = vrot.slane %v45_v32, %v53_v24 }
  0x2b   :  { %v64_v36 = vadd.f32 %v62_v35, %v56_v33  ;;  %v65_v37 = vadd.f32 %v62_v35, %v57_v34 }
  0x2d   :  { %v66_v38 = vmax.f32 %v64_v36, 0.0  ;;  %v67_v39 = vmax.f32 %v65_v37, 0.0 }
  0x2f   :  { %v93_v40 = vpack.c.bf16 %v67_v39, %v66_v38 }
  0x31   :  { %94 = vst [vmem:[%s150_s5] sm:$0xff] %v93_v40  }

// kernel: mixup_block_forward.4
= control target key start
LH: loop header
LB: loop body
LE: loop exit
PB: predicated region body
PF: predicated region fallthrough
CT: control target
= control target key end

     0   :  { %v290_v0 = vmov 0.0   ;;  %vm291_vm0 = vmmov 0   ;;  %s353_s1 = inlined_call_operand.vmem [shape: bf16[128,128], index: 1, kind: input, shape index: {}]   ;;  %s354_s0 = inlined_call_operand.vmem [shape: bf16[16,128], index: 0, kind: input, shape index: {}]   ;;  %s355_s2 = inlined_call_operand.vmem [shape: bf16[16,128], index: 2, kind: output, shape index: {0}]   ;;  %s356_s3 = inlined_call_operand.vmem [shape: f32[8,128], index: 3, kind: output, shape index: {1}]   ;;  %s357_s4 = inlined_call_operand.vmem [shape: f32[8,128], index: 4, kind: output, shape index: {2}]  }
   0x1   :  { %259 = vmatprep.subr.bf16.mxu0 %v290_v0  ;;  %v281_v1 = vld [vmem:[%s353_s1] sm:$0xff]   ;;  %275 = vmatprep.mubr.msk.bf16.mxu0 %vm291_vm0, %v290_v0  ;;  %v282_v2 = vld [vmem:[%s353_s1 + $0x8] sm:$0xff]   ;;  %v283_v3 = vld [vmem:[%s353_s1 + $0x10] sm:$0xff]  }
   0x2   :  { %260 = vmatpush3.bf16.msra.mxu0 %v281_v1  ;;  %v284_v4 = vld [vmem:[%s353_s1 + $0x18] sm:$0xff]   ;;  %v285_v5 = vld [vmem:[%s353_s1 + $0x20] sm:$0xff]   ;;  %v286_v6 = vld [vmem:[%s353_s1 + $0x28] sm:$0xff]  }
   0x3   :  { %261 = vmatprep.subr.bf16.mxu0 %v290_v0  ;;  %v287_v7 = vld [vmem:[%s353_s1 + $0x30] sm:$0xff]   ;;  %v288_v8 = vld [vmem:[%s353_s1 + $0x38] sm:$0xff]   ;;  %v289_v9 = vld [vmem:[%s354_s0] sm:$0xff]  }
   0x6   :  { %262 = vmatpush3.bf16.msra.mxu0 %v282_v2 }
   0x7   :  { %263 = vmatprep.subr.bf16.mxu0 %v290_v0 }
   0xa   :  { %264 = vmatpush3.bf16.msra.mxu0 %v283_v3 }
   0xb   :  { %265 = vmatprep.subr.bf16.mxu0 %v290_v0 }
   0xe   :  { %266 = vmatpush3.bf16.msra.mxu0 %v284_v4 }
   0xf   :  { %267 = vmatprep.subr.bf16.mxu0 %v290_v0 }
  0x12   :  { %268 = vmatpush3.bf16.msra.mxu0 %v285_v5 }
  0x13   :  { %269 = vmatprep.subr.bf16.mxu0 %v290_v0 }
  0x16   :  { %270 = vmatpush3.bf16.msra.mxu0 %v286_v6 }
  0x17   :  { %271 = vmatprep.subr.bf16.mxu0 %v290_v0 }
  0x1a   :  { %272 = vmatpush3.bf16.msra.mxu0 %v287_v7 }
  0x1b   :  { %273 = vmatprep.subr.bf16.mxu0 %v290_v0 }
  0x1e   :  { %274 = vmatpush3.bf16.msra.mxu0 %v288_v8 }
  0x21   :  { %276 = vmatmul.mubr.bf16.vlgmr.msra.gmra.mrb[0].mxu0 %v289_v9 }
  0xf4   :  { %v163_v10 = vpop.f32.mrb[0].mxu0 }
  0xf5   :  { %v277_v11 = vpop.f32.mrb[1].mxu0 }
  0xf6   :  { %v166_v12 = vpop.f32.mrb[2].mxu0 }
  0xf7   :  { %v170_v13 = vpack.c.bf16 %v166_v12, %v163_v10  ;;  %v278_v14 = vpop.f32.mrb[3].mxu0 }
  0xf9   :  { %249 = vst [vmem:[%s355_s2] sm:$0xff] %v170_v13   ;;  %v180_v15 = vunpack.c.l.bf16 %v170_v13  ;;  %v181_v16 = vunpack.c.h.bf16 %v170_v13 }
  0xfb   :  { %v183_v17 = vadd.f32 %v181_v16, %v180_v15  ;;  %v187_v18 = vmul.f32 %v180_v15, %v180_v15  ;;  %v188_v19 = vmul.f32 %v181_v16, %v181_v16 }
  0xfd   :  { %v189_v20 = vadd.f32 %v188_v19, %v187_v18  ;;  %185 = vst [vmem:[%s356_s3] sm:$0xff] %v183_v17 }
  0xff   :  { %191 = vst [vmem:[%s357_s4] sm:$0xff] %v189_v20 }

</bundles_post_ra>
